<compile_context>
chip_gen: v6e
topology: v6e:2x2x1
jax: 0.10.0
libtpu: 0.0.40
codegen_flags: <defaults>
</compile_context>

<pallas_src>
import jax
import jax.numpy as jnp
from jax.experimental import pallas as pl
from jax.experimental.pallas import tpu as pltpu

LANES = 128            # every feature/channel dim is zero-padded to the vreg lane width
DEF_BLOCK_ROWS = 512   # row tile of A_hat per grid step (>=512 ~ HBM roofline)
DEF_BLOCK_K = 2048     # reduction (column) tile of A_hat per grid step


def _round_up(x, m):
    return ((x + m - 1) // m) * m


def _pad2d(a, rows, cols, dtype):
    out = jnp.zeros((rows, cols), dtype)
    return out.at[: a.shape[0], : a.shape[1]].set(a.astype(dtype))


def plan_tiles(num_nodes, block_rows=DEF_BLOCK_ROWS, block_k=DEF_BLOCK_K):
    """Pick (tm, tk, n_pad) so both tiles divide n_pad and bf16 sublanes pack fully."""
    tm = min(block_rows, _round_up(num_nodes, 16))
    n_pad = _round_up(num_nodes, tm)
    q = n_pad // tm
    d = 1
    for cand in range(1, q + 1):              # largest multiple of tm that divides n_pad
        if q % cand == 0 and tm * cand <= block_k:
            d = cand
    return tm, tm * d, n_pad


def _vmem_limit_bytes():
    """Generation-aware VMEM cap: ~3/4 of physical (128 MiB v5e/v6e, 64 MiB/TC v7x)."""
    try:
        cap = getattr(pltpu.get_tpu_info(), "vmem_capacity_bytes", None)
        if cap:
            return min(int(cap) * 3 // 4, 100 * 1024 * 1024)
    except Exception:
        pass
    return 48 * 1024 * 1024


# ----------------------------- Pallas kernels ---------------------------------
def gcn_conv_kernel(a_ref, h_ref, w_ref, b_ref, o_ref, acc_ref):
    """One GCNConv + tanh on an (i, k) tile of A_hat:
         acc[i] += A[i, k] @ h[k]                       (f32 accumulator, K-streamed)
         at k == last:  o[i] = tanh(acc[i] @ W + b)     (A(hW) == (Ah)W, no extra work)
       a_ref: [tm, tk] bf16    h_ref: [tk, 128] bf16    w_ref: [128, 128] bf16
       b_ref: [1, 128] f32     o_ref: [tm, 128] bf16    acc_ref: [tm, 128] f32 scratch
    """
    k = pl.program_id(1)

    @pl.when(k == 0)
    def _():
        acc_ref[...] = jnp.zeros_like(acc_ref)

    acc_ref[...] += jnp.dot(a_ref[...], h_ref[...],
                            preferred_element_type=jnp.float32)

    @pl.when(k == pl.num_programs(1) - 1)
    def _():
        ah = acc_ref[...].astype(jnp.bfloat16)
        z = jnp.dot(ah, w_ref[...], preferred_element_type=jnp.float32) + b_ref[...]
        o_ref[...] = jnp.tanh(z).astype(o_ref.dtype)


def gcn_last_kernel(a_ref, h_ref, w3_ref, b3_ref, wc_ref, bc_ref,
                    out_ref, h_out_ref, acc_ref):
    """Final GCNConv + tanh fused with the (row-local) Linear classifier."""
    k = pl.program_id(1)

    @pl.when(k == 0)
    def _():
        acc_ref[...] = jnp.zeros_like(acc_ref)

    acc_ref[...] += jnp.dot(a_ref[...], h_ref[...],
                            preferred_element_type=jnp.float32)

    @pl.when(k == pl.num_programs(1) - 1)
    def _():
        ah = acc_ref[...].astype(jnp.bfloat16)
        h3 = jnp.tanh(jnp.dot(ah, w3_ref[...], preferred_element_type=jnp.float32)
                      + b3_ref[...])
        h_out_ref[...] = h3.astype(h_out_ref.dtype)                      # [tm, 128] bf16
        out_ref[...] = (jnp.dot(h3.astype(jnp.bfloat16), wc_ref[...],
                                preferred_element_type=jnp.float32)
                        + bc_ref[...])                                   # [tm, 128] f32


# ------------------------------- wrapper ---------------------------------------
def gcn_forward(a_p, x, params, num_classes, num_nodes, tm, tk):
    """a_p: [n_pad, n_pad] bf16 padded normalized adjacency (built once, outside).
       x:   [num_nodes, F] f32 node features.
       Returns (logits [N, C] f32, embedding h [N, 2] f32)."""
    n_pad = a_p.shape[0]
    w1, b1, w2, b2, w3, b3, wc, bc = params
    h_dim = w3.shape[1]
    assert max(x.shape[1], w1.shape[1], w2.shape[1], h_dim, num_classes) <= LANES
    assert n_pad % tm == 0 and n_pad % tk == 0

    grid = (n_pad // tm, n_pad // tk)          # (row blocks, reduction blocks)

    # Lane-dense, zero-padded operands.  Zero padding is exact: padded feature lanes
    # stay 0 through every layer (zero weight rows/cols, zero bias lanes) and padded
    # node rows/cols of A_hat are 0, so padded rows never contaminate real nodes.
    x_p = _pad2d(x, n_pad, LANES, jnp.bfloat16)
    w1_p, b1_p = _pad2d(w1, LANES, LANES, jnp.bfloat16), _pad2d(b1, 1, LANES, jnp.float32)
    w2_p, b2_p = _pad2d(w2, LANES, LANES, jnp.bfloat16), _pad2d(b2, 1, LANES, jnp.float32)
    w3_p, b3_p = _pad2d(w3, LANES, LANES, jnp.bfloat16), _pad2d(b3, 1, LANES, jnp.float32)
    wc_p, bc_p = _pad2d(wc, LANES, LANES, jnp.bfloat16), _pad2d(bc, 1, LANES, jnp.float32)

    a_spec = pl.BlockSpec((tm, tk), lambda i, k: (i, k))        # streamed A tiles
    h_spec = pl.BlockSpec((tk, LANES), lambda i, k: (k, 0))     # streamed prev-layer h
    w_spec = pl.BlockSpec((LANES, LANES), lambda i, k: (0, 0))  # tiny, constant
    b_spec = pl.BlockSpec((1, LANES), lambda i, k: (0, 0))
    row_out = pl.BlockSpec((tm, LANES), lambda i, k: (i, 0))    # resident across k

    cparams = pltpu.CompilerParams(
        dimension_semantics=("parallel", "arbitrary"),   # rows across TCs; k = reduction
        vmem_limit_bytes=_vmem_limit_bytes(),
    )
    acc = pltpu.VMEM((tm, LANES), jnp.float32)

    def conv_layer(h_in, w_p, b_p):
        return pl.pallas_call(
            gcn_conv_kernel,
            out_shape=jax.ShapeDtypeStruct((n_pad, LANES), jnp.bfloat16),
            grid=grid,
            in_specs=[a_spec, h_spec, w_spec, b_spec],
            out_specs=row_out,
            scratch_shapes=[acc],
            compiler_params=cparams,
        )(a_p, h_in, w_p, b_p)

    h1 = conv_layer(x_p, w1_p, b1_p)              # tanh(conv1(x))
    h2 = conv_layer(h1, w2_p, b2_p)               # tanh(conv2(h1))

    out_p, h3_p = pl.pallas_call(                 # tanh(conv3(h2)) + classifier, fused
        gcn_last_kernel,
        out_shape=(jax.ShapeDtypeStruct((n_pad, LANES), jnp.float32),
                   jax.ShapeDtypeStruct((n_pad, LANES), jnp.bfloat16)),
        grid=grid,
        in_specs=[a_spec, h_spec, w_spec, b_spec, w_spec, b_spec],
        out_specs=(row_out, row_out),
        scratch_shapes=[acc],
        compiler_params=cparams,
    )(a_p, h2, w3_p, b3_p, wc_p, bc_p)

    logits = out_p[:num_nodes, :num_classes]
    h = h3_p[:num_nodes, :h_dim].astype(jnp.float32)
    return logits, h


# ------------------------------- glue / setup ----------------------------------
def build_normalized_adjacency_padded(edge_index, num_nodes, n_pad, dtype=jnp.bfloat16):
    """A_hat = D^{-1/2} (A + I) D^{-1/2} built directly into the padded (n_pad, n_pad)
    kernel-dtype buffer (PyG gcn_norm semantics: duplicate edges sum; self-loops only
    added to nodes without one).  Padded rows/cols are exactly zero (deg==0 -> dinv=0).
    Built once, outside the per-forward path."""
    src, dst = edge_index[0], edge_index[1]
    a = jnp.zeros((n_pad, n_pad), jnp.float32)
    a = a.at[dst, src].add(1.0)                                   # message: src -> dst
    idx = jnp.arange(num_nodes)
    diag = a[idx, idx]
    a = a.at[idx, idx].add(jnp.where(diag == 0, 1.0, 0.0))        # add_remaining_self_loops
    deg = a.sum(axis=1)
    dinv = jnp.where(deg > 0, 1.0 / jnp.sqrt(deg), 0.0)
    return (dinv[:, None] * a * dinv[None, :]).astype(dtype)


def glorot(key, fan_in, fan_out):
    limit = jnp.sqrt(6.0 / (fan_in + fan_out))
    return jax.random.uniform(key, (fan_in, fan_out), jnp.float32, -limit, limit)


def init_params(key, num_features, num_classes):
    # TODO(synk): torch.manual_seed(12345) initial values are not bit-reproducible in JAX;
    # same init distributions (GCNConv glorot + zero bias, torch Linear uniform) are used.
    ks = jax.random.split(key, 5)
    w1 = glorot(ks[0], num_features, 4); b1 = jnp.zeros((1, 4), jnp.float32)
    w2 = glorot(ks[1], 4, 4);            b2 = jnp.zeros((1, 4), jnp.float32)
    w3 = glorot(ks[2], 4, 2);            b3 = jnp.zeros((1, 2), jnp.float32)
    lim = 1.0 / jnp.sqrt(2.0)            # Linear(2, C) torch default init
    wc = jax.random.uniform(ks[3], (2, num_classes), jnp.float32, -lim, lim)
    bc = jax.random.uniform(ks[4], (1, num_classes), jnp.float32, -lim, lim)
    return (w1, b1, w2, b2, w3, b3, wc, bc)


def gcn_reference(a_bf, x, params):
    """Pure-JAX reference mirroring the kernel numerics (bf16 A / h / W operands,
    f32 MXU accumulation, f32 bias + tanh)."""
    w1, b1, w2, b2, w3, b3, wc, bc = params

    def conv(h, w, b):
        ah = jnp.dot(a_bf, h.astype(jnp.bfloat16), preferred_element_type=jnp.float32)
        z = jnp.dot(ah.astype(jnp.bfloat16), w.astype(jnp.bfloat16),
                    preferred_element_type=jnp.float32) + b
        return jnp.tanh(z)

    h = conv(x, w1, b1)
    h = conv(h, w2, b2)
    h = conv(h, w3, b3)
    out = jnp.dot(h.astype(jnp.bfloat16), wc.astype(jnp.bfloat16),
                  preferred_element_type=jnp.float32) + bc
    return out, h


if __name__ == "__main__":
    # Small synthetic graph (stands in for the dataset): N nodes, F features, C classes.
    N, F, C = 32, 16, 4

    key = jax.random.PRNGKey(0)
    k_x, k_p = jax.random.split(key)
    x = jax.random.normal(k_x, (N, F), jnp.float32)

    # Deterministic undirected ring + chords, edge_index [2, E] with both directions.
    src = (list(range(N)) + [(i + 1) % N for i in range(N)]
           + list(range(N)) + [(i + 5) % N for i in range(N)])
    dst = ([(i + 1) % N for i in range(N)] + list(range(N))
           + [(i + 5) % N for i in range(N)] + list(range(N)))
    edge_index = jnp.array([src, dst], dtype=jnp.int32)

    tm, tk, n_pad = plan_tiles(N)
    a_p = build_normalized_adjacency_padded(edge_index, N, n_pad)   # once, padded bf16
    params = init_params(k_p, F, C)

    out, h = gcn_forward(a_p, x, params, C, N, tm, tk)
    jax.block_until_ready((out, h))

    assert out.shape == (N, C) and h.shape == (N, 2)
    assert bool(jnp.all(jnp.isfinite(out))) and bool(jnp.all(jnp.isfinite(h)))

    # Correctness check against a precision-matched pure-JAX reference.
    out_ref, h_ref = gcn_reference(a_p[:N, :N], x, params)
    assert float(jnp.max(jnp.abs(out - out_ref))) < 2e-2, "logits mismatch vs reference"
    assert float(jnp.max(jnp.abs(h - h_ref))) < 2e-2, "embedding mismatch vs reference"

    print("KERNEL_OK")
</pallas_src>

<mosaic_0001>
module attributes {stable_mosaic.version = 11 : i64} {
  func.func @gcn_conv_kernel(%arg0: i32, %arg1: i32, %arg2: memref<32x32xbf16, #tpu.memory_space<vmem>>, %arg3: memref<32x128xbf16, #tpu.memory_space<vmem>>, %arg4: memref<128x128xbf16, #tpu.memory_space<vmem>>, %arg5: memref<1x128xf32, #tpu.memory_space<vmem>>, %arg6: memref<32x128xbf16, #tpu.memory_space<vmem>>, %arg7: memref<32x128xf32, #tpu.memory_space<vmem>>) attributes {dimension_semantics = [#tpu.dimension_semantics<parallel>, #tpu.dimension_semantics<arbitrary>], iteration_bounds = array<i64: 1, 1>, scalar_prefetch = 0 : i64, scratch_operands = 1 : i64, tpu.core_type = #tpu.core_type<tc>, window_params = [{transform_indices = @transform_0, window_bounds = array<i64: 32, 32>}, {transform_indices = @transform_1, window_bounds = array<i64: 32, 128>}, {pipeline_mode = #tpu.pipeline_mode<synchronous>, transform_indices = @transform_2, window_bounds = array<i64: 128, 128>}, {pipeline_mode = #tpu.pipeline_mode<synchronous>, transform_indices = @transform_3, window_bounds = array<i64: 1, 128>}, {transform_indices = @transform_4, window_bounds = array<i64: 32, 128>}]} {
    %c0_i32 = arith.constant 0 : i32
    %0 = arith.cmpi eq, %arg1, %c0_i32 : i32
    %1 = arith.extui %0 : i1 to i32
    %c0_i32_0 = arith.constant 0 : i32
    %2 = arith.cmpi ne, %1, %c0_i32_0 : i32
    scf.if %2 {
      %cst_10 = arith.constant 0.000000e+00 : f32
      %12 = vector.broadcast %cst_10 : f32 to vector<32x128xf32>
      %c0_11 = arith.constant 0 : index
      %c0_12 = arith.constant 0 : index
      %13 = vector.load %arg7[%c0_11, %c0_12] : memref<32x128xf32, #tpu.memory_space<vmem>>, vector<32x128xf32>
      tpu.vector_store %arg7[%c0_11, %c0_12], %12 {strides = array<i32>} : memref<32x128xf32, #tpu.memory_space<vmem>>, vector<32x128xf32>,
    } else {
    }
    %c0 = arith.constant 0 : index
    %c0_1 = arith.constant 0 : index
    %3 = vector.load %arg7[%c0, %c0_1] : memref<32x128xf32, #tpu.memory_space<vmem>>, vector<32x128xf32>
    %c0_2 = arith.constant 0 : index
    %c0_3 = arith.constant 0 : index
    %4 = vector.load %arg2[%c0_2, %c0_3] : memref<32x32xbf16, #tpu.memory_space<vmem>>, vector<32x32xbf16>
    %c0_4 = arith.constant 0 : index
    %c0_5 = arith.constant 0 : index
    %5 = vector.load %arg3[%c0_4, %c0_5] : memref<32x128xbf16, #tpu.memory_space<vmem>>, vector<32x128xbf16>
    %cst = arith.constant dense<0.000000e+00> : vector<32x128xf32>
    %6 = tpu.matmul %4, %5, %cst {dimension_numbers = #tpu.dot_dimension_numbers<[1], [0], [0], [1], [0, 0, 1, 1], [], []>} : vector<32x32xbf16>, vector<32x128xbf16>, vector<32x128xf32> -> vector<32x128xf32>
    %7 = arith.addf %3, %6 : vector<32x128xf32>
    %c0_6 = arith.constant 0 : index
    %c0_7 = arith.constant 0 : index
    %8 = vector.load %arg7[%c0_6, %c0_7] : memref<32x128xf32, #tpu.memory_space<vmem>>, vector<32x128xf32>
    tpu.vector_store %arg7[%c0_6, %c0_7], %7 {strides = array<i32>} : memref<32x128xf32, #tpu.memory_space<vmem>>, vector<32x128xf32>,
    %c0_i32_8 = arith.constant 0 : i32
    %9 = arith.cmpi eq, %arg1, %c0_i32_8 : i32
    %10 = arith.extui %9 : i1 to i32
    %c0_i32_9 = arith.constant 0 : i32
    %11 = arith.cmpi ne, %10, %c0_i32_9 : i32
    scf.if %11 {
      %c0_10 = arith.constant 0 : index
      %c0_11 = arith.constant 0 : index
      %12 = vector.load %arg7[%c0_10, %c0_11] : memref<32x128xf32, #tpu.memory_space<vmem>>, vector<32x128xf32>
      %13 = arith.truncf %12 : vector<32x128xf32> to vector<32x128xbf16>
      %c0_12 = arith.constant 0 : index
      %c0_13 = arith.constant 0 : index
      %14 = vector.load %arg4[%c0_12, %c0_13] : memref<128x128xbf16, #tpu.memory_space<vmem>>, vector<128x128xbf16>
      %cst_14 = arith.constant dense<0.000000e+00> : vector<32x128xf32>
      %15 = tpu.matmul %13, %14, %cst_14 {dimension_numbers = #tpu.dot_dimension_numbers<[1], [0], [0], [1], [0, 0, 1, 1], [], []>} : vector<32x128xbf16>, vector<128x128xbf16>, vector<32x128xf32> -> vector<32x128xf32>
      %c0_15 = arith.constant 0 : index
      %c0_16 = arith.constant 0 : index
      %16 = vector.load %arg5[%c0_15, %c0_16] : memref<1x128xf32, #tpu.memory_space<vmem>>, vector<1x128xf32>
      %17 = vector.broadcast %16 : vector<1x128xf32> to vector<32x128xf32>
      %18 = arith.addf %15, %17 : vector<32x128xf32>
      %19 = math.tanh %18 : vector<32x128xf32>
      %20 = arith.truncf %19 : vector<32x128xf32> to vector<32x128xbf16>
      %c0_17 = arith.constant 0 : index
      %c0_18 = arith.constant 0 : index
      %21 = vector.load %arg6[%c0_17, %c0_18] : memref<32x128xbf16, #tpu.memory_space<vmem>>, vector<32x128xbf16>
      tpu.vector_store %arg6[%c0_17, %c0_18], %20 {strides = array<i32>} : memref<32x128xbf16, #tpu.memory_space<vmem>>, vector<32x128xbf16>,
    } else {
    }
    return
  }
  func.func @transform_0(%arg0: i32, %arg1: i32) -> (i32, i32) {
    %c0_i32 = arith.constant 0 : i32
    return %arg0, %arg1 : i32, i32
  }
  func.func @transform_1(%arg0: i32, %arg1: i32) -> (i32, i32) {
    %c0_i32 = arith.constant 0 : i32
    %c0_i32_0 = arith.constant 0 : i32
    return %arg1, %c0_i32 : i32, i32
  }
  func.func @transform_2(%arg0: i32, %arg1: i32) -> (i32, i32) {
    %c0_i32 = arith.constant 0 : i32
    %c0_i32_0 = arith.constant 0 : i32
    %c0_i32_1 = arith.constant 0 : i32
    return %c0_i32, %c0_i32_0 : i32, i32
  }
  func.func @transform_3(%arg0: i32, %arg1: i32) -> (i32, i32) {
    %c0_i32 = arith.constant 0 : i32
    %c0_i32_0 = arith.constant 0 : i32
    %c0_i32_1 = arith.constant 0 : i32
    return %c0_i32, %c0_i32_0 : i32, i32
  }
  func.func @transform_4(%arg0: i32, %arg1: i32) -> (i32, i32) {
    %c0_i32 = arith.constant 0 : i32
    %c0_i32_0 = arith.constant 0 : i32
    return %arg0, %c0_i32 : i32, i32
  }
}

</mosaic_0001>

<bundles_post_ra>
// kernel: tpu_custom_call.1
= control target key start
LH: loop header
LB: loop body
LE: loop exit
PB: predicated region body
PF: predicated region fallthrough
CT: control target
= control target key end

     0   :  { %9 = vsyncpa [#allocation4], 0  ;;  %s583_s0 = inlined_call_operand.hbm [shape: bf16[32,32], index: 0, kind: input, shape index: {}]   ;;  %s584_s1 = inlined_call_operand.hbm [shape: bf16[32,128], index: 1, kind: input, shape index: {}]   ;;  %s585_s2 = inlined_call_operand.hbm [shape: bf16[128,128], index: 2, kind: input, shape index: {}]   ;;  %s586_s3 = inlined_call_operand.vmem [shape: f32[1,128], index: 3, kind: input, shape index: {}]   ;;  %s587_s4 = inlined_call_operand.hbm [shape: bf16[32,128], index: 4, kind: output, shape index: {}]  }
   0x1   :  { %10 = vsyncpa [#allocation7], 0 }
   0x2   :  { %11 = vsyncpa [#allocation5], 0  ;;  %s525_s15 = smov [#allocation6]   ;;  %s526_s17 = smov [#allocation3]  }
   0x3   :  { %s29_s16 = sshll.u32 %s525_s15, 4  ;;  %s17_s18 = sshll.u32 %s526_s17, 4  ;;  %s30_s16 = int_to_ptr.vmem [resolvable:$true] %s29_s16  ;;  %s18_s18 = int_to_ptr.vmem [resolvable:$true] %s17_s18 }
   0x4   :  { %s447_s19 = scalar_lea.vmem %s30_s16, 256  ;;  %p452_p1 = scmp.lt.s32.totalorder %s30_s16, %s30_s16 }
   0x5   :  { %p448_p0 = scmp.ne.s32.totalorder %s30_s16, %s447_s19  ;;  %p453_p2 = scmp.lt.s32.totalorder %s447_s19, %s447_s19 }
   0x7   :  { %p454_p3 = por %p453_p2, %p452_p1 }
   0x9   :  { %p455_p4 = pnand %p454_p3, %p448_p0 }
   0xb   :  { %458 = shalt.err (!%p455_p4)
}
   0xc   :  { %s527_s20 = smov 64   ;;  %s528_s21 = smov 4  }
   0xd   :  { %35 = dma.hbm_to_vmem [thread:$0]  %s584_s1, 256, %s30_s16, [#allocation7], %s527_s20, %s527_s20, %s528_s21  }
   0xe   :  { %s467_s24 = scalar_lea.vmem %s18_s18, 256  ;;  %p472_p6 = scmp.lt.s32.totalorder %s18_s18, %s18_s18 }
   0xf   :  { %p468_p5 = scmp.ne.s32.totalorder %s18_s18, %s467_s24  ;;  %p473_p7 = scmp.lt.s32.totalorder %s467_s24, %s467_s24 }
  0x11   :  { %p474_p8 = por %p473_p7, %p472_p6 }
  0x13   :  { %p475_p9 = pnand %p474_p8, %p468_p5 }
  0x15   :  { %478 = shalt.err (!%p475_p9)
}
  0x16   :  { %23 = dma.hbm_to_vmem [thread:$0]  %s583_s0, 256, %s18_s18, [#allocation4], %s527_s20, %s527_s20, %s528_s21  }
  0x17   :  { %s529_s27 = smov [#allocation8]  }
  0x18   :  { %s41_s28 = sshll.u32 %s529_s27, 4  ;;  %s42_s28 = int_to_ptr.vmem [resolvable:$true] %s41_s28 }
  0x19   :  { %s487_s29 = scalar_lea.vmem %s42_s28, 1024  ;;  %p492_p11 = scmp.lt.s32.totalorder %s42_s28, %s42_s28 }
  0x1a   :  { %p488_p10 = scmp.ne.s32.totalorder %s42_s28, %s487_s29  ;;  %p493_p12 = scmp.lt.s32.totalorder %s487_s29, %s487_s29 }
  0x1c   :  { %p494_p13 = por %p493_p12, %p492_p11 }
  0x1e   :  { %p495_p0 = pnand %p494_p13, %p488_p10 }
  0x20   :  { %498 = shalt.err (!%p495_p0)
}
  0x21   :  { %47 = dma.hbm_to_vmem [thread:$0]  %s585_s2, 1024, %s42_s28, [#allocation7], %s527_s20, %s527_s20, %s528_s21  }
  0x22   :  { %519 = dma.done.wait [#allocation4], 256  }
  0x23   :  { %520 = vsyncadd [#allocation4], 4294967040 }
  0x24   :  { %521 = dma.done.wait [#allocation7], 1280  }
  0x25   :  { %522 = vsyncadd [#allocation7], 4294966016  ;;  %v419_v0 = vld [vmem:[#allocation6 + $0x8] sm:$0xff]   ;;  %v420_v1 = vld [vmem:[#allocation6] sm:$0xff]   ;;  %vm102_vm0 = vcmask 261120   ;;  %s530_s5 = smov [#allocation9]  }
  0x26   :  { %385 = vmatprep.subr.bf16.mxu0 %v419_v0  ;;  %v421_v2 = vld [vmem:[#allocation3] sm:$0xff]   ;;  %v423_v3 = vld [vmem:[#allocation8 + $0x38] sm:$0xff]   ;;  %v424_v4 = vld [vmem:[#allocation8 + $0x30] sm:$0xff]   ;;  %s324_s6 = sshll.u32 %s530_s5, 4  ;;  %s325_s6 = int_to_ptr.vmem [resolvable:$true] %s324_s6 }
  0x27   :  { %386 = vmatpush3.bf16.msra.mxu0 %v419_v0  ;;  %389 = vmatprep.mubr.msk.bf16.mxu0 %vm102_vm0, %v421_v2  ;;  %v422_v5 = vld [vmem:[#allocation3 + $0x8] sm:$0xff]   ;;  %v426_v7 = vld [vmem:[#allocation8 + $0x20] sm:$0xff]   ;;  %v427_v8 = vld [vmem:[#allocation8 + $0x18] sm:$0xff]   ;;  %p504_p2 = scmp.lt.s32.totalorder %s325_s6, %s325_s6 }
  0x28   :  { %387 = vmatprep.subr.bf16.mxu0 %v420_v1  ;;  %393 = vmatprep.subr.bf16.mxu1 %v423_v3  ;;  %v425_v6 = vld [vmem:[#allocation8 + $0x28] sm:$0xff]   ;;  %v428_v9 = vld [vmem:[#allocation8 + $0x10] sm:$0xff]   ;;  %v430_v11 = vld [vmem:[#allocation8] sm:$0xff]  }
  0x29   :  { %394 = vmatpush3.bf16.msra.mxu1 %v423_v3  ;;  %v429_v10 = vld [vmem:[#allocation8 + $0x8] sm:$0xff]   ;;  %v343_v18 = vld [vmem:[%s586_s3] ss:$0 sm:$0xff]  ;;  %s499_s3 = scalar_lea.vmem %s325_s6, 256 }
  0x2a   :  { %395 = vmatprep.subr.bf16.mxu1 %v424_v4  ;;  %p500_p1 = scmp.ne.s32.totalorder %s325_s6, %s499_s3  ;;  %p505_p3 = scmp.lt.s32.totalorder %s499_s3, %s499_s3 }
  0x2b   :  { %388 = vmatpush3.bf16.msra.mxu0 %v420_v1 }
  0x2c   :  { %p506_p4 = por %p505_p3, %p504_p2 }
  0x2d   :  { %396 = vmatpush3.bf16.msra.mxu1 %v424_v4 }
  0x2e   :  { %390 = vmatmul.mubr.msk.bf16.vlgmr.msra.gmra.mxu0 %vm102_vm0, %v422_v5  ;;  %397 = vmatprep.subr.bf16.mxu1 %v425_v6  ;;  %p507_p5 = pnand %p506_p4, %p500_p1 }
  0x31   :  { %398 = vmatpush3.bf16.msra.mxu1 %v425_v6 }
  0x32   :  { %399 = vmatprep.subr.bf16.mxu1 %v426_v7 }
  0x35   :  { %400 = vmatpush3.bf16.msra.mxu1 %v426_v7 }
  0x36   :  { %401 = vmatprep.subr.bf16.mxu1 %v427_v8 }
  0x39   :  { %402 = vmatpush3.bf16.msra.mxu1 %v427_v8 }
  0x3a   :  { %403 = vmatprep.subr.bf16.mxu1 %v428_v9 }
  0x3d   :  { %404 = vmatpush3.bf16.msra.mxu1 %v428_v9 }
  0x3e   :  { %405 = vmatprep.subr.bf16.mxu1 %v429_v10 }
  0x41   :  { %406 = vmatpush3.bf16.msra.mxu1 %v429_v10 }
  0x42   :  { %407 = vmatprep.subr.bf16.mxu1 %v430_v11 }
  0x45   :  { %408 = vmatpush3.bf16.msra.mxu1 %v430_v11 }
  0xee   :  { %v391_v12 = vpop.f32.mrf.mxu0 }
  0xf0   :  { %v143_v13 = vpop.f32.mrf.mxu0 }
  0xf2   :  { %v392_v14 = vpop.f32.mrf.mxu0 }
  0xf3   :  { %v174_v17 = vpack.c.bf16 %v392_v14, %v391_v12 }
  0xf4   :  { %v146_v15 = vpop.f32.mrf.mxu0 }
  0xf5   :  { %v173_v16 = vpack.c.bf16 %v146_v15, %v143_v13 }
  0xf7   :  { %409 = vmatprep.mubr.bf16.mxu1 %v173_v16 }
  0xf8   :  { %410 = vmatmul.mubr.bf16.vlgmr.msra.gmra.mxu1 %v174_v17 }
 0x1b8   :  { %v411_v19 = vpop.f32.mrf.mxu1 }
 0x1b9   :  { %v289_v20 = vadd.f32 %v411_v19, %v343_v18 }
 0x1ba   :  { %v280_v21 = vpop.f32.mrf.mxu1 }
 0x1bb   :  { %v281_v22 = vadd.f32 %v343_v18, %v280_v21  ;;  %431 = vtanh.f32 %v289_v20 }
 0x1bc   :  { %v412_v23 = vpop.f32.mrf.mxu1 }
 0x1bd   :  { %v292_v24 = vadd.f32 %v412_v23, %v343_v18 }
 0x1be   :  { %v283_v25 = vpop.f32.mrf.mxu1 }
 0x1bf   :  { %433 = vtanh.f32 %v292_v24  ;;  %v284_v26 = vadd.f32 %v343_v18, %v283_v25 }
 0x1c0   :  { %435 = vtanh.f32 %v281_v22 }
 0x1c1   :  { %437 = vtanh.f32 %v284_v26 }
 0x1c8   :  { %v432_v27 = vpop.eup %431 }
 0x1cc   :  { %v434_v28 = vpop.eup %433 }
 0x1cd   :  { %v436_v29 = vpop.eup %435  ;;  %v368_v30 = vpack.c.bf16 %v434_v28, %v432_v27 }
 0x1ce   :  { %v438_v31 = vpop.eup %437 }
 0x1cf   :  { %v363_v32 = vpack.c.bf16 %v438_v31, %v436_v29  ;;  %370 = vst [vmem:[#allocation9 + $0x8] sm:$0xff] %v368_v30  }
 0x1d1   :  { %364 = vst [vmem:[#allocation9] sm:$0xff] %v363_v32  }
 0x1d2   :  { %510 = shalt.err (!%p507_p5)
}
 0x1d3   :  { %330 = dma.vmem_to_hbm [thread:$0]  %s325_s6, 256, %s587_s4, [#allocation5], %s527_s20, %s527_s20, %s528_s21  }
 0x1d4   :  { %523 = dma.done.wait [#allocation5], 256  }
 0x1d5   :  { %524 = vsyncadd [#allocation5], 4294967040 }
 0x1d6   :  { %334 = vsyncpa [#allocation4], 1 }
 0x1d7   :  { %335 = vsyncpa [#allocation7], 1 }
 0x1d8   :  { %336 = vsyncpa [#allocation5], 1 }

</bundles_post_ra>
